<compile_context>
chip_gen: v7x
topology: tpu7x:2x2x1
jax: 0.10.0
libtpu: 0.0.40
codegen_flags: <defaults>
</compile_context>

<pallas_src>
import functools

import jax
import jax.numpy as jnp
from jax.experimental import pallas as pl
from jax.experimental.pallas import tpu as pltpu


HP = 128  # lane-padded hidden / output width (multiple of 128 -> lane-dense)


def _round_up(x, m):
    return ((x + m - 1) // m) * m


# ----------------------------------------------------------------------------
# Fused forward kernel: encoder -> aggregator -> decoder in one body
# ----------------------------------------------------------------------------
def _fused_forward_kernel(tgt_ref, surr_ref, map_ref,
                          w_t_ref, w_s_ref, w_m_ref, w_agg_ref, w_head_ref, b_ref,
                          o_ref, *, traj_dim, num_modes):
    f32 = jnp.float32
    n_surr = surr_ref.shape[0]
    n_lanes = map_ref.shape[0]

    # ---- target-agent encoder (writes lanes [0:H]) ------------------------
    tgt_e = jnp.maximum(
        jnp.dot(tgt_ref[...], w_t_ref[...], preferred_element_type=f32)
        + b_ref[0:1, :], 0.0)

    # ---- surrounding-agent encoder + entity max-pool (VPU running max) ----
    w_s = w_s_ref[...]
    s_max = jnp.dot(surr_ref[0], w_s, preferred_element_type=f32)
    for e in range(1, n_surr):
        s_max = jnp.maximum(
            s_max, jnp.dot(surr_ref[e], w_s, preferred_element_type=f32))
    s_pool = jnp.maximum(s_max + b_ref[1:2, :], 0.0)        # lanes [H:2H]

    # ---- map encoder + lane max-pool (VPU running max) --------------------
    w_m = w_m_ref[...]
    m_max = jnp.dot(map_ref[0], w_m, preferred_element_type=f32)
    for e in range(1, n_lanes):
        m_max = jnp.maximum(
            m_max, jnp.dot(map_ref[e], w_m, preferred_element_type=f32))
    m_pool = jnp.maximum(m_max + b_ref[2:3, :], 0.0)        # lanes [2H:3H]

    # ---- aggregator: concat-by-addition (disjoint lane slots), ONE matmul --
    agg_in = (tgt_e + s_pool + m_pool).astype(w_agg_ref.dtype)
    agg = jnp.maximum(
        jnp.dot(agg_in, w_agg_ref[...], preferred_element_type=f32)
        + b_ref[3:4, :], 0.0)                                # (TB, HP), lanes [0:H]

    # ---- decoder: merged traj + prob head, single MXU pass -----------------
    head = jnp.dot(agg.astype(w_head_ref.dtype), w_head_ref[...],
                   preferred_element_type=f32) + b_ref[4:5, :]
    # lanes [0, traj_dim)                 : trajectory outputs
    # lanes [traj_dim, traj_dim+num_modes): mode logits
    # remaining lanes                     : zero padding

    # masked softmax over the mode-logit lanes, full 128-lane row (lane-dense)
    col = jax.lax.broadcasted_iota(jnp.int32, head.shape, 1)
    is_prob = jnp.logical_and(col >= traj_dim, col < traj_dim + num_modes)
    masked = jnp.where(is_prob, head, jnp.float32(-1e30))
    mmax = jnp.max(masked, axis=-1, keepdims=True)
    e_exp = jnp.where(is_prob, jnp.exp(masked - mmax), 0.0)
    probs = e_exp / jnp.sum(e_exp, axis=-1, keepdims=True)

    o_ref[...] = jnp.where(is_prob, probs, head).astype(o_ref.dtype)


# ----------------------------------------------------------------------------
# Model: deterministic parameter init + fused forward pass
# ----------------------------------------------------------------------------
class PredictionModelPallas:
    def __init__(self, *, t_hist=8, f_target=5, f_surr=5, n_surr=6,
                 n_lanes=10, pts_per_lane=8, f_map=6,
                 hidden=32, num_modes=4, t_out=12, seed=0,
                 max_tile_b=1024, param_dtype=jnp.bfloat16):
        self.cfg = dict(t_hist=t_hist, f_target=f_target, f_surr=f_surr,
                        n_surr=n_surr, n_lanes=n_lanes, pts_per_lane=pts_per_lane,
                        f_map=f_map, hidden=hidden, num_modes=num_modes, t_out=t_out)
        self.max_tile_b = max_tile_b
        self.param_dtype = param_dtype
        self.traj_dim = num_modes * t_out * 2
        assert self.traj_dim + num_modes <= HP, "decoder outputs must fit one 128-lane slab"
        assert 3 * hidden <= HP, "lane-slot packing needs 3*hidden <= 128"

        key = jax.random.PRNGKey(seed)
        ks = jax.random.split(key, 12)

        def init_linear(kw, kb, d_in, d_out):
            w = jax.random.normal(kw, (d_in, d_out), jnp.float32) * (1.0 / jnp.sqrt(d_in))
            b = jax.random.normal(kb, (d_out,), jnp.float32) * 0.01
            return w, b

        H = hidden
        d_t = t_hist * f_target
        d_s = t_hist * f_surr
        d_m = pts_per_lane * f_map

        # raw (un-padded) parameters — same init as the reference instantiation
        w_t, b_t = init_linear(ks[0], ks[1], d_t, H)
        w_s, b_s = init_linear(ks[2], ks[3], d_s, H)
        w_m, b_m = init_linear(ks[4], ks[5], d_m, H)
        w_agg, b_agg = init_linear(ks[6], ks[7], 3 * H, H)
        w_traj, b_traj = init_linear(ks[8], ks[9], H, self.traj_dim)
        w_prob, b_prob = init_linear(ks[10], ks[11], H, num_modes)

        # ---- lane-slot-packed, lane-dense parameters for the fused kernel ----
        # encoder slots: target -> lanes [0:H], surr -> [H:2H], map -> [2H:3H]
        def slot_pad(w, slot):
            out = jnp.zeros((w.shape[0], HP), jnp.float32)
            return out.at[:, slot * H:slot * H + H].set(w)

        self.w_t_p = slot_pad(w_t, 0).astype(param_dtype)    # (d_t, 128)
        self.w_s_p = slot_pad(w_s, 1).astype(param_dtype)    # (d_s, 128)
        self.w_m_p = slot_pad(w_m, 2).astype(param_dtype)    # (d_m, 128)

        # aggregator: rows [0:3H] (matching the lane slots) x cols [0:H]
        w_agg_p = jnp.zeros((HP, HP), jnp.float32)
        w_agg_p = w_agg_p.at[:3 * H, :H].set(w_agg)
        self.w_agg_p = w_agg_p.astype(param_dtype)           # (128, 128)

        # merged decoder head: cols [0,traj_dim)=w_traj, [traj_dim,traj_dim+K)=w_prob
        w_head_p = jnp.zeros((HP, HP), jnp.float32)
        w_head_p = w_head_p.at[:H, :self.traj_dim].set(w_traj)
        w_head_p = w_head_p.at[:H, self.traj_dim:self.traj_dim + num_modes].set(w_prob)
        self.w_head_p = w_head_p.astype(param_dtype)         # (128, 128)

        # all biases packed into one (8, 128) f32 slab -> one DMA
        b_p = jnp.zeros((8, HP), jnp.float32)
        b_p = b_p.at[0, 0:H].set(b_t)
        b_p = b_p.at[1, H:2 * H].set(b_s)
        b_p = b_p.at[2, 2 * H:3 * H].set(b_m)
        b_p = b_p.at[3, 0:H].set(b_agg)
        b_p = b_p.at[4, :self.traj_dim].set(b_traj)
        b_p = b_p.at[4, self.traj_dim:self.traj_dim + num_modes].set(b_prob)
        self.b_p = b_p                                       # (8, 128)

    # batch tile: multiple of 8, big enough to amortize per-step overhead,
    # >= 2 grid steps when possible so v7x megacore uses both TensorCores.
    def _pick_tile(self, B):
        b8 = _round_up(max(B, 1), 8)
        if b8 < 16:
            return b8
        return min(self.max_tile_b, _round_up(pl.cdiv(b8, 2), 8))

    # ---- full forward (mirrors PredictionModel.forward, default branch) ----
    def forward(self, inputs, is_test=False, is_val=False):
        # TODO(synk): is_test / is_val auxiliary outputs not reproduced (abstract encoder).
        c = self.cfg
        bf16 = jnp.bfloat16
        tgt = inputs["target_agent_representation"]          # (B, T, F_t)
        surr = inputs["surrounding_agent_representation"]    # (B, N, T, F_s)
        hd_map = inputs["map_representation"]                # (B, L, P, F_m)
        B = tgt.shape[0]
        n_surr, n_lanes = c["n_surr"], c["n_lanes"]
        d_t = c["t_hist"] * c["f_target"]
        d_s = c["t_hist"] * c["f_surr"]
        d_m = c["pts_per_lane"] * c["f_map"]

        # layout plumbing in the wrapper: bf16 streams, entity axis outermost
        tgt_x = tgt.reshape(B, d_t).astype(bf16)                               # (B, d_t)
        surr_x = jnp.swapaxes(surr.reshape(B, n_surr, d_s), 0, 1).astype(bf16)  # (N, B, d_s)
        map_x = jnp.swapaxes(hd_map.reshape(B, n_lanes, d_m), 0, 1).astype(bf16)  # (L, B, d_m)

        TB = self._pick_tile(B)
        Bpad = _round_up(B, TB)
        if Bpad != B:
            pad = Bpad - B
            tgt_x = jnp.pad(tgt_x, ((0, pad), (0, 0)))
            surr_x = jnp.pad(surr_x, ((0, 0), (0, pad), (0, 0)))
            map_x = jnp.pad(map_x, ((0, 0), (0, pad), (0, 0)))
        grid = (Bpad // TB,)

        kernel = functools.partial(
            _fused_forward_kernel,
            traj_dim=self.traj_dim, num_modes=c["num_modes"])

        out_slab = pl.pallas_call(
            kernel,
            out_shape=jax.ShapeDtypeStruct((Bpad, HP), jnp.float32),
            grid=grid,
            in_specs=[
                pl.BlockSpec((TB, d_t), lambda i: (i, 0)),
                pl.BlockSpec((n_surr, TB, d_s), lambda i: (0, i, 0)),
                pl.BlockSpec((n_lanes, TB, d_m), lambda i: (0, i, 0)),
                pl.BlockSpec((d_t, HP), lambda i: (0, 0)),
                pl.BlockSpec((d_s, HP), lambda i: (0, 0)),
                pl.BlockSpec((d_m, HP), lambda i: (0, 0)),
                pl.BlockSpec((HP, HP), lambda i: (0, 0)),
                pl.BlockSpec((HP, HP), lambda i: (0, 0)),
                pl.BlockSpec((8, HP), lambda i: (0, 0)),
            ],
            out_specs=pl.BlockSpec((TB, HP), lambda i: (i, 0)),
            compiler_params=pltpu.CompilerParams(
                dimension_semantics=("parallel",)),
        )(tgt_x, surr_x, map_x,
          self.w_t_p, self.w_s_p, self.w_m_p, self.w_agg_p, self.w_head_p, self.b_p)

        out_slab = out_slab[:B]
        traj = out_slab[:, :self.traj_dim].reshape(B, c["num_modes"], c["t_out"], 2)
        probs = out_slab[:, self.traj_dim:self.traj_dim + c["num_modes"]]
        return {"traj": traj, "probs": probs}


# ----------------------------------------------------------------------------
# Demo
# ----------------------------------------------------------------------------
if __name__ == "__main__":
    B = 2
    model = PredictionModelPallas(seed=0)
    c = model.cfg

    key = jax.random.PRNGKey(0)
    k1, k2, k3 = jax.random.split(key, 3)
    inputs = {
        "target_agent_representation": jax.random.normal(
            k1, (B, c["t_hist"], c["f_target"]), jnp.float32),
        "surrounding_agent_representation": jax.random.normal(
            k2, (B, c["n_surr"], c["t_hist"], c["f_surr"]), jnp.float32),
        "map_representation": jax.random.normal(
            k3, (B, c["n_lanes"], c["pts_per_lane"], c["f_map"]), jnp.float32),
    }

    outputs = model.forward(inputs)
    outputs = jax.block_until_ready(outputs)

    assert outputs["traj"].shape == (B, c["num_modes"], c["t_out"], 2)
    assert outputs["probs"].shape == (B, c["num_modes"])
    # probabilities sum to 1 per batch row and are non-negative
    assert jnp.allclose(jnp.sum(outputs["probs"], axis=-1), 1.0, atol=1e-5)
    assert bool(jnp.all(outputs["probs"] >= 0.0))
    assert bool(jnp.all(jnp.isfinite(outputs["traj"])))

    print("KERNEL_OK")
</pallas_src>

<mosaic_0001>
module attributes {stable_mosaic.version = 11 : i64} {
  func.func @_fused_forward_kernel(%arg0: i32, %arg1: memref<8x40xbf16, #tpu.memory_space<vmem>>, %arg2: memref<6x8x40xbf16, #tpu.memory_space<vmem>>, %arg3: memref<10x8x48xbf16, #tpu.memory_space<vmem>>, %arg4: memref<40x128xbf16, #tpu.memory_space<vmem>>, %arg5: memref<40x128xbf16, #tpu.memory_space<vmem>>, %arg6: memref<48x128xbf16, #tpu.memory_space<vmem>>, %arg7: memref<128x128xbf16, #tpu.memory_space<vmem>>, %arg8: memref<128x128xbf16, #tpu.memory_space<vmem>>, %arg9: memref<8x128xf32, #tpu.memory_space<vmem>>, %arg10: memref<8x128xf32, #tpu.memory_space<vmem>>) attributes {dimension_semantics = [#tpu.dimension_semantics<parallel>], iteration_bounds = array<i64: 1>, scalar_prefetch = 0 : i64, scratch_operands = 0 : i64, tpu.core_type = #tpu.core_type<tc>, window_params = [{transform_indices = @transform_0, window_bounds = array<i64: 8, 40>}, {transform_indices = @transform_1, window_bounds = array<i64: 6, 8, 40>}, {transform_indices = @transform_2, window_bounds = array<i64: 10, 8, 48>}, {pipeline_mode = #tpu.pipeline_mode<synchronous>, transform_indices = @transform_3, window_bounds = array<i64: 40, 128>}, {pipeline_mode = #tpu.pipeline_mode<synchronous>, transform_indices = @transform_4, window_bounds = array<i64: 40, 128>}, {pipeline_mode = #tpu.pipeline_mode<synchronous>, transform_indices = @transform_5, window_bounds = array<i64: 48, 128>}, {pipeline_mode = #tpu.pipeline_mode<synchronous>, transform_indices = @transform_6, window_bounds = array<i64: 128, 128>}, {pipeline_mode = #tpu.pipeline_mode<synchronous>, transform_indices = @transform_7, window_bounds = array<i64: 128, 128>}, {pipeline_mode = #tpu.pipeline_mode<synchronous>, transform_indices = @transform_8, window_bounds = array<i64: 8, 128>}, {transform_indices = @transform_9, window_bounds = array<i64: 8, 128>}]} {
    %c0 = arith.constant 0 : index
    %c0_0 = arith.constant 0 : index
    %0 = vector.load %arg1[%c0, %c0_0] : memref<8x40xbf16, #tpu.memory_space<vmem>>, vector<8x40xbf16>
    %c0_1 = arith.constant 0 : index
    %c0_2 = arith.constant 0 : index
    %1 = vector.load %arg4[%c0_1, %c0_2] : memref<40x128xbf16, #tpu.memory_space<vmem>>, vector<40x128xbf16>
    %cst = arith.constant dense<0.000000e+00> : vector<8x128xf32>
    %2 = tpu.matmul %0, %1, %cst {dimension_numbers = #tpu.dot_dimension_numbers<[1], [0], [0], [1], [0, 0, 1, 1], [], []>} : vector<8x40xbf16>, vector<40x128xbf16>, vector<8x128xf32> -> vector<8x128xf32>
    %c0_3 = arith.constant 0 : index
    %c0_4 = arith.constant 0 : index
    %3 = vector.load %arg9[%c0_3, %c0_4] : memref<8x128xf32, #tpu.memory_space<vmem>>, vector<1x128xf32>
    %4 = vector.broadcast %3 : vector<1x128xf32> to vector<8x128xf32>
    %5 = arith.addf %2, %4 : vector<8x128xf32>
    %cst_5 = arith.constant 0.000000e+00 : f32
    %6 = vector.broadcast %cst_5 : f32 to vector<8x128xf32>
    %7 = arith.maximumf %5, %6 : vector<8x128xf32>
    %c0_6 = arith.constant 0 : index
    %c0_7 = arith.constant 0 : index
    %8 = vector.load %arg5[%c0_6, %c0_7] : memref<40x128xbf16, #tpu.memory_space<vmem>>, vector<40x128xbf16>
    %c0_8 = arith.constant 0 : index
    %c0_9 = arith.constant 0 : index
    %c0_10 = arith.constant 0 : index
    %9 = vector.load %arg2[%c0_8, %c0_9, %c0_10] : memref<6x8x40xbf16, #tpu.memory_space<vmem>>, vector<1x8x40xbf16>
    %10 = vector.shape_cast %9 : vector<1x8x40xbf16> to vector<8x40xbf16>
    %cst_11 = arith.constant dense<0.000000e+00> : vector<8x128xf32>
    %11 = tpu.matmul %10, %8, %cst_11 {dimension_numbers = #tpu.dot_dimension_numbers<[1], [0], [0], [1], [0, 0, 1, 1], [], []>} : vector<8x40xbf16>, vector<40x128xbf16>, vector<8x128xf32> -> vector<8x128xf32>
    %c1 = arith.constant 1 : index
    %c0_12 = arith.constant 0 : index
    %c0_13 = arith.constant 0 : index
    %12 = vector.load %arg2[%c1, %c0_12, %c0_13] : memref<6x8x40xbf16, #tpu.memory_space<vmem>>, vector<1x8x40xbf16>
    %13 = vector.shape_cast %12 : vector<1x8x40xbf16> to vector<8x40xbf16>
    %cst_14 = arith.constant dense<0.000000e+00> : vector<8x128xf32>
    %14 = tpu.matmul %13, %8, %cst_14 {dimension_numbers = #tpu.dot_dimension_numbers<[1], [0], [0], [1], [0, 0, 1, 1], [], []>} : vector<8x40xbf16>, vector<40x128xbf16>, vector<8x128xf32> -> vector<8x128xf32>
    %15 = arith.maximumf %11, %14 : vector<8x128xf32>
    %c2 = arith.constant 2 : index
    %c0_15 = arith.constant 0 : index
    %c0_16 = arith.constant 0 : index
    %16 = vector.load %arg2[%c2, %c0_15, %c0_16] : memref<6x8x40xbf16, #tpu.memory_space<vmem>>, vector<1x8x40xbf16>
    %17 = vector.shape_cast %16 : vector<1x8x40xbf16> to vector<8x40xbf16>
    %cst_17 = arith.constant dense<0.000000e+00> : vector<8x128xf32>
    %18 = tpu.matmul %17, %8, %cst_17 {dimension_numbers = #tpu.dot_dimension_numbers<[1], [0], [0], [1], [0, 0, 1, 1], [], []>} : vector<8x40xbf16>, vector<40x128xbf16>, vector<8x128xf32> -> vector<8x128xf32>
    %19 = arith.maximumf %15, %18 : vector<8x128xf32>
    %c3 = arith.constant 3 : index
    %c0_18 = arith.constant 0 : index
    %c0_19 = arith.constant 0 : index
    %20 = vector.load %arg2[%c3, %c0_18, %c0_19] : memref<6x8x40xbf16, #tpu.memory_space<vmem>>, vector<1x8x40xbf16>
    %21 = vector.shape_cast %20 : vector<1x8x40xbf16> to vector<8x40xbf16>
    %cst_20 = arith.constant dense<0.000000e+00> : vector<8x128xf32>
    %22 = tpu.matmul %21, %8, %cst_20 {dimension_numbers = #tpu.dot_dimension_numbers<[1], [0], [0], [1], [0, 0, 1, 1], [], []>} : vector<8x40xbf16>, vector<40x128xbf16>, vector<8x128xf32> -> vector<8x128xf32>
    %23 = arith.maximumf %19, %22 : vector<8x128xf32>
    %c4 = arith.constant 4 : index
    %c0_21 = arith.constant 0 : index
    %c0_22 = arith.constant 0 : index
    %24 = vector.load %arg2[%c4, %c0_21, %c0_22] : memref<6x8x40xbf16, #tpu.memory_space<vmem>>, vector<1x8x40xbf16>
    %25 = vector.shape_cast %24 : vector<1x8x40xbf16> to vector<8x40xbf16>
    %cst_23 = arith.constant dense<0.000000e+00> : vector<8x128xf32>
    %26 = tpu.matmul %25, %8, %cst_23 {dimension_numbers = #tpu.dot_dimension_numbers<[1], [0], [0], [1], [0, 0, 1, 1], [], []>} : vector<8x40xbf16>, vector<40x128xbf16>, vector<8x128xf32> -> vector<8x128xf32>
    %27 = arith.maximumf %23, %26 : vector<8x128xf32>
    %c5 = arith.constant 5 : index
    %c0_24 = arith.constant 0 : index
    %c0_25 = arith.constant 0 : index
    %28 = vector.load %arg2[%c5, %c0_24, %c0_25] : memref<6x8x40xbf16, #tpu.memory_space<vmem>>, vector<1x8x40xbf16>
    %29 = vector.shape_cast %28 : vector<1x8x40xbf16> to vector<8x40xbf16>
    %cst_26 = arith.constant dense<0.000000e+00> : vector<8x128xf32>
    %30 = tpu.matmul %29, %8, %cst_26 {dimension_numbers = #tpu.dot_dimension_numbers<[1], [0], [0], [1], [0, 0, 1, 1], [], []>} : vector<8x40xbf16>, vector<40x128xbf16>, vector<8x128xf32> -> vector<8x128xf32>
    %31 = arith.maximumf %27, %30 : vector<8x128xf32>
    %c1_27 = arith.constant 1 : index
    %c0_28 = arith.constant 0 : index
    %32 = vector.load %arg9[%c1_27, %c0_28] : memref<8x128xf32, #tpu.memory_space<vmem>>, vector<1x128xf32>
    %33 = vector.broadcast %32 : vector<1x128xf32> to vector<8x128xf32>
    %34 = arith.addf %31, %33 : vector<8x128xf32>
    %cst_29 = arith.constant 0.000000e+00 : f32
    %35 = vector.broadcast %cst_29 : f32 to vector<8x128xf32>
    %36 = arith.maximumf %34, %35 : vector<8x128xf32>
    %c0_30 = arith.constant 0 : index
    %c0_31 = arith.constant 0 : index
    %37 = vector.load %arg6[%c0_30, %c0_31] : memref<48x128xbf16, #tpu.memory_space<vmem>>, vector<48x128xbf16>
    %c0_32 = arith.constant 0 : index
    %c0_33 = arith.constant 0 : index
    %c0_34 = arith.constant 0 : index
    %38 = vector.load %arg3[%c0_32, %c0_33, %c0_34] : memref<10x8x48xbf16, #tpu.memory_space<vmem>>, vector<1x8x48xbf16>
    %39 = vector.shape_cast %38 : vector<1x8x48xbf16> to vector<8x48xbf16>
    %cst_35 = arith.constant dense<0.000000e+00> : vector<8x128xf32>
    %40 = tpu.matmul %39, %37, %cst_35 {dimension_numbers = #tpu.dot_dimension_numbers<[1], [0], [0], [1], [0, 0, 1, 1], [], []>} : vector<8x48xbf16>, vector<48x128xbf16>, vector<8x128xf32> -> vector<8x128xf32>
    %c1_36 = arith.constant 1 : index
    %c0_37 = arith.constant 0 : index
    %c0_38 = arith.constant 0 : index
    %41 = vector.load %arg3[%c1_36, %c0_37, %c0_38] : memref<10x8x48xbf16, #tpu.memory_space<vmem>>, vector<1x8x48xbf16>
    %42 = vector.shape_cast %41 : vector<1x8x48xbf16> to vector<8x48xbf16>
    %cst_39 = arith.constant dense<0.000000e+00> : vector<8x128xf32>
    %43 = tpu.matmul %42, %37, %cst_39 {dimension_numbers = #tpu.dot_dimension_numbers<[1], [0], [0], [1], [0, 0, 1, 1], [], []>} : vector<8x48xbf16>, vector<48x128xbf16>, vector<8x128xf32> -> vector<8x128xf32>
    %44 = arith.maximumf %40, %43 : vector<8x128xf32>
    %c2_40 = arith.constant 2 : index
    %c0_41 = arith.constant 0 : index
    %c0_42 = arith.constant 0 : index
    %45 = vector.load %arg3[%c2_40, %c0_41, %c0_42] : memref<10x8x48xbf16, #tpu.memory_space<vmem>>, vector<1x8x48xbf16>
    %46 = vector.shape_cast %45 : vector<1x8x48xbf16> to vector<8x48xbf16>
    %cst_43 = arith.constant dense<0.000000e+00> : vector<8x128xf32>
    %47 = tpu.matmul %46, %37, %cst_43 {dimension_numbers = #tpu.dot_dimension_numbers<[1], [0], [0], [1], [0, 0, 1, 1], [], []>} : vector<8x48xbf16>, vector<48x128xbf16>, vector<8x128xf32> -> vector<8x128xf32>
    %48 = arith.maximumf %44, %47 : vector<8x128xf32>
    %c3_44 = arith.constant 3 : index
    %c0_45 = arith.constant 0 : index
    %c0_46 = arith.constant 0 : index
    %49 = vector.load %arg3[%c3_44, %c0_45, %c0_46] : memref<10x8x48xbf16, #tpu.memory_space<vmem>>, vector<1x8x48xbf16>
    %50 = vector.shape_cast %49 : vector<1x8x48xbf16> to vector<8x48xbf16>
    %cst_47 = arith.constant dense<0.000000e+00> : vector<8x128xf32>
    %51 = tpu.matmul %50, %37, %cst_47 {dimension_numbers = #tpu.dot_dimension_numbers<[1], [0], [0], [1], [0, 0, 1, 1], [], []>} : vector<8x48xbf16>, vector<48x128xbf16>, vector<8x128xf32> -> vector<8x128xf32>
    %52 = arith.maximumf %48, %51 : vector<8x128xf32>
    %c4_48 = arith.constant 4 : index
    %c0_49 = arith.constant 0 : index
    %c0_50 = arith.constant 0 : index
    %53 = vector.load %arg3[%c4_48, %c0_49, %c0_50] : memref<10x8x48xbf16, #tpu.memory_space<vmem>>, vector<1x8x48xbf16>
    %54 = vector.shape_cast %53 : vector<1x8x48xbf16> to vector<8x48xbf16>
    %cst_51 = arith.constant dense<0.000000e+00> : vector<8x128xf32>
    %55 = tpu.matmul %54, %37, %cst_51 {dimension_numbers = #tpu.dot_dimension_numbers<[1], [0], [0], [1], [0, 0, 1, 1], [], []>} : vector<8x48xbf16>, vector<48x128xbf16>, vector<8x128xf32> -> vector<8x128xf32>
    %56 = arith.maximumf %52, %55 : vector<8x128xf32>
    %c5_52 = arith.constant 5 : index
    %c0_53 = arith.constant 0 : index
    %c0_54 = arith.constant 0 : index
    %57 = vector.load %arg3[%c5_52, %c0_53, %c0_54] : memref<10x8x48xbf16, #tpu.memory_space<vmem>>, vector<1x8x48xbf16>
    %58 = vector.shape_cast %57 : vector<1x8x48xbf16> to vector<8x48xbf16>
    %cst_55 = arith.constant dense<0.000000e+00> : vector<8x128xf32>
    %59 = tpu.matmul %58, %37, %cst_55 {dimension_numbers = #tpu.dot_dimension_numbers<[1], [0], [0], [1], [0, 0, 1, 1], [], []>} : vector<8x48xbf16>, vector<48x128xbf16>, vector<8x128xf32> -> vector<8x128xf32>
    %60 = arith.maximumf %56, %59 : vector<8x128xf32>
    %c6 = arith.constant 6 : index
    %c0_56 = arith.constant 0 : index
    %c0_57 = arith.constant 0 : index
    %61 = vector.load %arg3[%c6, %c0_56, %c0_57] : memref<10x8x48xbf16, #tpu.memory_space<vmem>>, vector<1x8x48xbf16>
    %62 = vector.shape_cast %61 : vector<1x8x48xbf16> to vector<8x48xbf16>
    %cst_58 = arith.constant dense<0.000000e+00> : vector<8x128xf32>
    %63 = tpu.matmul %62, %37, %cst_58 {dimension_numbers = #tpu.dot_dimension_numbers<[1], [0], [0], [1], [0, 0, 1, 1], [], []>} : vector<8x48xbf16>, vector<48x128xbf16>, vector<8x128xf32> -> vector<8x128xf32>
    %64 = arith.maximumf %60, %63 : vector<8x128xf32>
    %c7 = arith.constant 7 : index
    %c0_59 = arith.constant 0 : index
    %c0_60 = arith.constant 0 : index
    %65 = vector.load %arg3[%c7, %c0_59, %c0_60] : memref<10x8x48xbf16, #tpu.memory_space<vmem>>, vector<1x8x48xbf16>
    %66 = vector.shape_cast %65 : vector<1x8x48xbf16> to vector<8x48xbf16>
    %cst_61 = arith.constant dense<0.000000e+00> : vector<8x128xf32>
    %67 = tpu.matmul %66, %37, %cst_61 {dimension_numbers = #tpu.dot_dimension_numbers<[1], [0], [0], [1], [0, 0, 1, 1], [], []>} : vector<8x48xbf16>, vector<48x128xbf16>, vector<8x128xf32> -> vector<8x128xf32>
    %68 = arith.maximumf %64, %67 : vector<8x128xf32>
    %c8 = arith.constant 8 : index
    %c0_62 = arith.constant 0 : index
    %c0_63 = arith.constant 0 : index
    %69 = vector.load %arg3[%c8, %c0_62, %c0_63] : memref<10x8x48xbf16, #tpu.memory_space<vmem>>, vector<1x8x48xbf16>
    %70 = vector.shape_cast %69 : vector<1x8x48xbf16> to vector<8x48xbf16>
    %cst_64 = arith.constant dense<0.000000e+00> : vector<8x128xf32>
    %71 = tpu.matmul %70, %37, %cst_64 {dimension_numbers = #tpu.dot_dimension_numbers<[1], [0], [0], [1], [0, 0, 1, 1], [], []>} : vector<8x48xbf16>, vector<48x128xbf16>, vector<8x128xf32> -> vector<8x128xf32>
    %72 = arith.maximumf %68, %71 : vector<8x128xf32>
    %c9 = arith.constant 9 : index
    %c0_65 = arith.constant 0 : index
    %c0_66 = arith.constant 0 : index
    %73 = vector.load %arg3[%c9, %c0_65, %c0_66] : memref<10x8x48xbf16, #tpu.memory_space<vmem>>, vector<1x8x48xbf16>
    %74 = vector.shape_cast %73 : vector<1x8x48xbf16> to vector<8x48xbf16>
    %cst_67 = arith.constant dense<0.000000e+00> : vector<8x128xf32>
    %75 = tpu.matmul %74, %37, %cst_67 {dimension_numbers = #tpu.dot_dimension_numbers<[1], [0], [0], [1], [0, 0, 1, 1], [], []>} : vector<8x48xbf16>, vector<48x128xbf16>, vector<8x128xf32> -> vector<8x128xf32>
    %76 = arith.maximumf %72, %75 : vector<8x128xf32>
    %c2_68 = arith.constant 2 : index
    %c0_69 = arith.constant 0 : index
    %77 = vector.load %arg9[%c2_68, %c0_69] : memref<8x128xf32, #tpu.memory_space<vmem>>, vector<1x128xf32>
    %78 = vector.broadcast %77 : vector<1x128xf32> to vector<8x128xf32>
    %79 = arith.addf %76, %78 : vector<8x128xf32>
    %cst_70 = arith.constant 0.000000e+00 : f32
    %80 = vector.broadcast %cst_70 : f32 to vector<8x128xf32>
    %81 = arith.maximumf %79, %80 : vector<8x128xf32>
    %82 = arith.addf %7, %36 : vector<8x128xf32>
    %83 = arith.addf %82, %81 : vector<8x128xf32>
    %84 = arith.truncf %83 : vector<8x128xf32> to vector<8x128xbf16>
    %c0_71 = arith.constant 0 : index
    %c0_72 = arith.constant 0 : index
    %85 = vector.load %arg7[%c0_71, %c0_72] : memref<128x128xbf16, #tpu.memory_space<vmem>>, vector<128x128xbf16>
    %cst_73 = arith.constant dense<0.000000e+00> : vector<8x128xf32>
    %86 = tpu.matmul %84, %85, %cst_73 {dimension_numbers = #tpu.dot_dimension_numbers<[1], [0], [0], [1], [0, 0, 1, 1], [], []>} : vector<8x128xbf16>, vector<128x128xbf16>, vector<8x128xf32> -> vector<8x128xf32>
    %c3_74 = arith.constant 3 : index
    %c0_75 = arith.constant 0 : index
    %87 = vector.load %arg9[%c3_74, %c0_75] : memref<8x128xf32, #tpu.memory_space<vmem>>, vector<1x128xf32>
    %88 = vector.broadcast %87 : vector<1x128xf32> to vector<8x128xf32>
    %89 = arith.addf %86, %88 : vector<8x128xf32>
    %cst_76 = arith.constant 0.000000e+00 : f32
    %90 = vector.broadcast %cst_76 : f32 to vector<8x128xf32>
    %91 = arith.maximumf %89, %90 : vector<8x128xf32>
    %92 = arith.truncf %91 : vector<8x128xf32> to vector<8x128xbf16>
    %c0_77 = arith.constant 0 : index
    %c0_78 = arith.constant 0 : index
    %93 = vector.load %arg8[%c0_77, %c0_78] : memref<128x128xbf16, #tpu.memory_space<vmem>>, vector<128x128xbf16>
    %cst_79 = arith.constant dense<0.000000e+00> : vector<8x128xf32>
    %94 = tpu.matmul %92, %93, %cst_79 {dimension_numbers = #tpu.dot_dimension_numbers<[1], [0], [0], [1], [0, 0, 1, 1], [], []>} : vector<8x128xbf16>, vector<128x128xbf16>, vector<8x128xf32> -> vector<8x128xf32>
    %c4_80 = arith.constant 4 : index
    %c0_81 = arith.constant 0 : index
    %95 = vector.load %arg9[%c4_80, %c0_81] : memref<8x128xf32, #tpu.memory_space<vmem>>, vector<1x128xf32>
    %96 = vector.broadcast %95 : vector<1x128xf32> to vector<8x128xf32>
    %97 = arith.addf %94, %96 : vector<8x128xf32>
    %98 = tpu.iota {dimensions = array<i32: 1>} : vector<8x128xi32>
    %c96_i32 = arith.constant 96 : i32
    %99 = vector.broadcast %c96_i32 : i32 to vector<8x128xi32>
    %100 = arith.cmpi sge, %98, %99 : vector<8x128xi32>
    %c100_i32 = arith.constant 100 : i32
    %101 = vector.broadcast %c100_i32 : i32 to vector<8x128xi32>
    %102 = arith.cmpi slt, %98, %101 : vector<8x128xi32>
    %103 = arith.andi %100, %102 : vector<8x128xi1>
    %cst_82 = arith.constant -1.000000e+30 : f32
    %104 = vector.broadcast %cst_82 : f32 to vector<8x128xf32>
    %105 = arith.select %103, %97, %104 : vector<8x128xi1>, vector<8x128xf32>
    %cst_83 = arith.constant dense<0xFF800000> : vector<8xf32>
    %106 = vector.multi_reduction <maximumf>, %105, %cst_83 [1] : vector<8x128xf32> to vector<8xf32>
    %107 = vector.shape_cast %106 : vector<8xf32> to vector<8x1xf32>
    %108 = vector.broadcast %107 : vector<8x1xf32> to vector<8x128xf32>
    %109 = arith.subf %105, %108 : vector<8x128xf32>
    %110 = math.exp %109 : vector<8x128xf32>
    %cst_84 = arith.constant 0.000000e+00 : f32
    %111 = vector.broadcast %cst_84 : f32 to vector<8x128xf32>
    %112 = arith.select %103, %110, %111 : vector<8x128xi1>, vector<8x128xf32>
    %cst_85 = arith.constant dense<0.000000e+00> : vector<8xf32>
    %113 = vector.multi_reduction <add>, %112, %cst_85 [1] : vector<8x128xf32> to vector<8xf32>
    %114 = vector.shape_cast %113 : vector<8xf32> to vector<8x1xf32>
    %115 = vector.broadcast %114 : vector<8x1xf32> to vector<8x128xf32>
    %116 = arith.divf %112, %115 : vector<8x128xf32>
    %117 = arith.select %103, %116, %97 : vector<8x128xi1>, vector<8x128xf32>
    %c0_86 = arith.constant 0 : index
    %c0_87 = arith.constant 0 : index
    %118 = vector.load %arg10[%c0_86, %c0_87] : memref<8x128xf32, #tpu.memory_space<vmem>>, vector<8x128xf32>
    tpu.vector_store %arg10[%c0_86, %c0_87], %117 {strides = array<i32>} : memref<8x128xf32, #tpu.memory_space<vmem>>, vector<8x128xf32>,
    return
  }
  func.func @transform_0(%arg0: i32) -> (i32, i32) {
    %c0_i32 = arith.constant 0 : i32
    %c0_i32_0 = arith.constant 0 : i32
    return %arg0, %c0_i32 : i32, i32
  }
  func.func @transform_1(%arg0: i32) -> (i32, i32, i32) {
    %c0_i32 = arith.constant 0 : i32
    %c0_i32_0 = arith.constant 0 : i32
    %c0_i32_1 = arith.constant 0 : i32
    return %c0_i32, %arg0, %c0_i32_0 : i32, i32, i32
  }
  func.func @transform_2(%arg0: i32) -> (i32, i32, i32) {
    %c0_i32 = arith.constant 0 : i32
    %c0_i32_0 = arith.constant 0 : i32
    %c0_i32_1 = arith.constant 0 : i32
    return %c0_i32, %arg0, %c0_i32_0 : i32, i32, i32
  }
  func.func @transform_3(%arg0: i32) -> (i32, i32) {
    %c0_i32 = arith.constant 0 : i32
    %c0_i32_0 = arith.constant 0 : i32
    %c0_i32_1 = arith.constant 0 : i32
    return %c0_i32, %c0_i32_0 : i32, i32
  }
  func.func @transform_4(%arg0: i32) -> (i32, i32) {
    %c0_i32 = arith.constant 0 : i32
    %c0_i32_0 = arith.constant 0 : i32
    %c0_i32_1 = arith.constant 0 : i32
    return %c0_i32, %c0_i32_0 : i32, i32
  }
  func.func @transform_5(%arg0: i32) -> (i32, i32) {
    %c0_i32 = arith.constant 0 : i32
    %c0_i32_0 = arith.constant 0 : i32
    %c0_i32_1 = arith.constant 0 : i32
    return %c0_i32, %c0_i32_0 : i32, i32
  }
  func.func @transform_6(%arg0: i32) -> (i32, i32) {
    %c0_i32 = arith.constant 0 : i32
    %c0_i32_0 = arith.constant 0 : i32
    %c0_i32_1 = arith.constant 0 : i32
    return %c0_i32, %c0_i32_0 : i32, i32
  }
  func.func @transform_7(%arg0: i32) -> (i32, i32) {
    %c0_i32 = arith.constant 0 : i32
    %c0_i32_0 = arith.constant 0 : i32
    %c0_i32_1 = arith.constant 0 : i32
    return %c0_i32, %c0_i32_0 : i32, i32
  }
  func.func @transform_8(%arg0: i32) -> (i32, i32) {
    %c0_i32 = arith.constant 0 : i32
    %c0_i32_0 = arith.constant 0 : i32
    %c0_i32_1 = arith.constant 0 : i32
    return %c0_i32, %c0_i32_0 : i32, i32
  }
  func.func @transform_9(%arg0: i32) -> (i32, i32) {
    %c0_i32 = arith.constant 0 : i32
    %c0_i32_0 = arith.constant 0 : i32
    return %arg0, %c0_i32 : i32, i32
  }
}

</mosaic_0001>

<bundles_post_ra>
// kernel: tpu_custom_call.1
= control target key start
LH: loop header
LB: loop body
LE: loop exit
PB: predicated region body
PF: predicated region fallthrough
CT: control target
= control target key end

     0   :  { %14 = vsyncpa [#allocation3], 0  ;;  %s2248_s0 = inlined_call_operand.hbm [shape: bf16[8,40], index: 0, kind: input, shape index: {}]   ;;  %s2249_s1 = inlined_call_operand.hbm [shape: bf16[6,8,40], index: 1, kind: input, shape index: {}]   ;;  %s2250_s2 = inlined_call_operand.hbm [shape: bf16[10,8,48], index: 2, kind: input, shape index: {}]   ;;  %s2251_s3 = inlined_call_operand.hbm [shape: bf16[40,128], index: 3, kind: input, shape index: {}]   ;;  %s2252_s4 = inlined_call_operand.hbm [shape: bf16[40,128], index: 4, kind: input, shape index: {}]   ;;  %s2253_s5 = inlined_call_operand.hbm [shape: bf16[48,128], index: 5, kind: input, shape index: {}]   ;;  %s2254_s6 = inlined_call_operand.hbm [shape: bf16[128,128], index: 6, kind: input, shape index: {}]   ;;  %s2255_s7 = inlined_call_operand.hbm [shape: bf16[128,128], index: 7, kind: input, shape index: {}]   ;;  %s2256_s8 = inlined_call_operand.vmem [shape: f32[8,128], index: 8, kind: input, shape index: {}]   ;;  %s2257_s9 = inlined_call_operand.hbm [shape: f32[8,128], index: 9, kind: output, shape index: {}]  }
   0x1   :  { %15 = vsyncpa [#allocation6], 0 }
   0x2   :  { %16 = vsyncpa [#allocation9], 0 }
   0x3   :  { %17 = vsyncpa [#allocation12], 0 }
   0x4   :  { %18 = vsyncpa [#allocation15], 0 }
   0x5   :  { %19 = vsyncpa [#allocation4], 0  ;;  %s1865_s30 = smov [#allocation5]   ;;  %s1655_s13 = scalar_lea.hbm %s2249_s1, 384 }
   0x6   :  { %s35_s10 = sshll.u32 %s1865_s30, 4  ;;  %p1656_p0 = scmp.ne.s32.totalorder %s2249_s1, %s1655_s13  ;;  %s36_s10 = int_to_ptr.vmem [resolvable:$true] %s35_s10 }
   0x7   :  { %p1659_p1 = scmp.lt.u32.totalorder %s1655_s13, %s2249_s1 }
   0x9   :  { %p1661_p2 = pnand %p1659_p1, %p1656_p0 }
   0xb   :  { %1664 = shalt.err (!%p1661_p2)
}
   0xc   :  { %s1665_s18 = scalar_lea.vmem %s36_s10, 384  ;;  %p1670_p4 = scmp.lt.s32.totalorder %s36_s10, %s36_s10 }
   0xd   :  { %p1666_p3 = scmp.ne.s32.totalorder %s36_s10, %s1665_s18  ;;  %p1671_p5 = scmp.lt.s32.totalorder %s1665_s18, %s1665_s18 }
   0xf   :  { %p1672_p6 = por %p1671_p5, %p1670_p4 }
  0x11   :  { %p1673_p7 = pnand %p1672_p6, %p1666_p3 }
  0x13   :  { %1676 = shalt.err (!%p1673_p7)
}
  0x14   :  { %s1866_s19 = smov 64   ;;  %s1867_s20 = smov 4  }
  0x15   :  { %41 = dma.hbm_to_vmem [thread:$0]  %s2249_s1, 384, %s36_s10, [#allocation6], %s1866_s19, %s1866_s19, %s1867_s20  }
  0x16   :  { %s1868_s23 = smov [#allocation8]   ;;  %s1869_s25 = smov [#allocation11]  }
  0x17   :  { %s59_s24 = sshll.u32 %s1868_s23, 4  ;;  %s83_s26 = sshll.u32 %s1869_s25, 4  ;;  %s60_s24 = int_to_ptr.vmem [resolvable:$true] %s59_s24  ;;  %s84_s26 = int_to_ptr.vmem [resolvable:$true] %s83_s26 }
  0x18   :  { %s1677_s29 = scalar_lea.hbm %s2251_s3, 320 }
  0x19   :  { %p1678_p8 = scmp.ne.s32.totalorder %s2251_s3, %s1677_s29  ;;  %p1681_p9 = scmp.lt.u32.totalorder %s1677_s29, %s2251_s3 }
  0x1b   :  { %p1683_p10 = pnand %p1681_p9, %p1678_p8 }
  0x1d   :  { %1686 = shalt.err (!%p1683_p10)
}
  0x1e   :  { %s1687_s1 = scalar_lea.vmem %s60_s24, 320  ;;  %p1692_p12 = scmp.lt.s32.totalorder %s60_s24, %s60_s24 }
  0x1f   :  { %p1688_p11 = scmp.ne.s32.totalorder %s60_s24, %s1687_s1  ;;  %p1693_p13 = scmp.lt.s32.totalorder %s1687_s1, %s1687_s1 }
  0x21   :  { %p1694_p0 = por %p1693_p13, %p1692_p12 }
  0x23   :  { %p1695_p1 = pnand %p1694_p0, %p1688_p11 }
  0x25   :  { %1698 = shalt.err (!%p1695_p1)
}
  0x26   :  { %65 = dma.hbm_to_vmem [thread:$0]  %s2251_s3, 320, %s60_s24, [#allocation9], %s1866_s19, %s1866_s19, %s1867_s20  }
  0x27   :  { %s1699_s17 = scalar_lea.hbm %s2253_s5, 384 }
  0x28   :  { %p1700_p2 = scmp.ne.s32.totalorder %s2253_s5, %s1699_s17  ;;  %p1703_p3 = scmp.lt.u32.totalorder %s1699_s17, %s2253_s5 }
  0x2a   :  { %p1705_p4 = pnand %p1703_p3, %p1700_p2 }
  0x2c   :  { %1708 = shalt.err (!%p1705_p4)
}
  0x2d   :  { %s1709_s25 = scalar_lea.vmem %s84_s26, 384  ;;  %p1714_p6 = scmp.lt.s32.totalorder %s84_s26, %s84_s26 }
  0x2e   :  { %p1710_p5 = scmp.ne.s32.totalorder %s84_s26, %s1709_s25  ;;  %p1715_p7 = scmp.lt.s32.totalorder %s1709_s25, %s1709_s25 }
  0x30   :  { %p1716_p8 = por %p1715_p7, %p1714_p6 }
  0x32   :  { %p1717_p9 = pnand %p1716_p8, %p1710_p5 }
  0x34   :  { %1720 = shalt.err (!%p1717_p9)
}
  0x35   :  { %89 = dma.hbm_to_vmem [thread:$0]  %s2253_s5, 384, %s84_s26, [#allocation12], %s1866_s19, %s1866_s19, %s1867_s20  }
  0x36   :  { %s1870_s27 = smov [#allocation2]   ;;  %s1871_s29 = smov [#allocation7]  }
  0x37   :  { %s26_s28 = sshll.u32 %s1870_s27, 4  ;;  %s47_s30 = sshll.u32 %s1871_s29, 4  ;;  %s27_s28 = int_to_ptr.vmem [resolvable:$true] %s26_s28  ;;  %s48_s30 = int_to_ptr.vmem [resolvable:$true] %s47_s30 }
  0x38   :  { %s1721_s13 = scalar_lea.hbm %s2248_s0, 64 }
  0x39   :  { %p1722_p10 = scmp.ne.s32.totalorder %s2248_s0, %s1721_s13  ;;  %p1725_p11 = scmp.lt.u32.totalorder %s1721_s13, %s2248_s0 }
  0x3b   :  { %p1727_p12 = pnand %p1725_p11, %p1722_p10 }
  0x3d   :  { %1730 = shalt.err (!%p1727_p12)
}
  0x3e   :  { %s1731_s5 = scalar_lea.vmem %s27_s28, 64  ;;  %p1736_p0 = scmp.lt.s32.totalorder %s27_s28, %s27_s28 }
  0x3f   :  { %p1732_p13 = scmp.ne.s32.totalorder %s27_s28, %s1731_s5  ;;  %p1737_p1 = scmp.lt.s32.totalorder %s1731_s5, %s1731_s5 }
  0x41   :  { %p1738_p2 = por %p1737_p1, %p1736_p0 }
  0x43   :  { %p1739_p3 = pnand %p1738_p2, %p1732_p13 }
  0x45   :  { %1742 = shalt.err (!%p1739_p3)
}
  0x46   :  { %29 = dma.hbm_to_vmem [thread:$0]  %s2248_s0, 64, %s27_s28, [#allocation3]  }
  0x47   :  { %s1743_s21 = scalar_lea.hbm %s2250_s2, 640 }
  0x48   :  { %p1744_p4 = scmp.ne.s32.totalorder %s2250_s2, %s1743_s21  ;;  %p1747_p5 = scmp.lt.u32.totalorder %s1743_s21, %s2250_s2 }
  0x4a   :  { %p1749_p6 = pnand %p1747_p5, %p1744_p4 }
  0x4c   :  { %1752 = shalt.err (!%p1749_p6)
}
  0x4d   :  { %s1753_s24 = scalar_lea.vmem %s48_s30, 640  ;;  %p1758_p8 = scmp.lt.s32.totalorder %s48_s30, %s48_s30 }
  0x4e   :  { %p1754_p7 = scmp.ne.s32.totalorder %s48_s30, %s1753_s24  ;;  %p1759_p9 = scmp.lt.s32.totalorder %s1753_s24, %s1753_s24 }
  0x50   :  { %p1760_p10 = por %p1759_p9, %p1758_p8 }
  0x52   :  { %p1761_p11 = pnand %p1760_p10, %p1754_p7 }
  0x54   :  { %1764 = shalt.err (!%p1761_p11)
}
  0x55   :  { %53 = dma.hbm_to_vmem [thread:$0]  %s2250_s2, 640, %s48_s30, [#allocation6], %s1866_s19, %s1866_s19, %s1867_s20  }
  0x56   :  { %s1872_s28 = smov [#allocation10]   ;;  %s1873_s11 = smov [#allocation13]  }
  0x57   :  { %s71_s29 = sshll.u32 %s1872_s28, 4  ;;  %s95_s12 = sshll.u32 %s1873_s11, 4  ;;  %s72_s29 = int_to_ptr.vmem [resolvable:$true] %s71_s29  ;;  %s96_s12 = int_to_ptr.vmem [resolvable:$true] %s95_s12 }
  0x58   :  { %s1765_s10 = scalar_lea.hbm %s2252_s4, 320 }
  0x59   :  { %p1766_p12 = scmp.ne.s32.totalorder %s2252_s4, %s1765_s10  ;;  %p1769_p13 = scmp.lt.u32.totalorder %s1765_s10, %s2252_s4 }
  0x5b   :  { %p1771_p0 = pnand %p1769_p13, %p1766_p12 }
  0x5d   :  { %1774 = shalt.err (!%p1771_p0)
}
  0x5e   :  { %s1775_s2 = scalar_lea.vmem %s72_s29, 320  ;;  %p1780_p2 = scmp.lt.s32.totalorder %s72_s29, %s72_s29 }
  0x5f   :  { %p1776_p1 = scmp.ne.s32.totalorder %s72_s29, %s1775_s2  ;;  %p1781_p3 = scmp.lt.s32.totalorder %s1775_s2, %s1775_s2 }
  0x61   :  { %p1782_p4 = por %p1781_p3, %p1780_p2 }
  0x63   :  { %p1783_p5 = pnand %p1782_p4, %p1776_p1 }
  0x65   :  { %1786 = shalt.err (!%p1783_p5)
}
  0x66   :  { %77 = dma.hbm_to_vmem [thread:$0]  %s2252_s4, 320, %s72_s29, [#allocation9], %s1866_s19, %s1866_s19, %s1867_s20  }
  0x67   :  { %s1787_s21 = scalar_lea.hbm %s2254_s6, 1024 }
  0x68   :  { %p1788_p6 = scmp.ne.s32.totalorder %s2254_s6, %s1787_s21  ;;  %p1791_p7 = scmp.lt.u32.totalorder %s1787_s21, %s2254_s6 }
  0x6a   :  { %p1793_p8 = pnand %p1791_p7, %p1788_p6 }
  0x6c   :  { %1796 = shalt.err (!%p1793_p8)
}
  0x6d   :  { %s1797_s24 = scalar_lea.vmem %s96_s12, 1024  ;;  %p1802_p10 = scmp.lt.s32.totalorder %s96_s12, %s96_s12 }
  0x6e   :  { %p1798_p9 = scmp.ne.s32.totalorder %s96_s12, %s1797_s24  ;;  %p1803_p11 = scmp.lt.s32.totalorder %s1797_s24, %s1797_s24 }
  0x70   :  { %p1804_p12 = por %p1803_p11, %p1802_p10 }
  0x72   :  { %p1805_p13 = pnand %p1804_p12, %p1798_p9 }
  0x74   :  { %1808 = shalt.err (!%p1805_p13)
}
  0x75   :  { %101 = dma.hbm_to_vmem [thread:$0]  %s2254_s6, 1024, %s96_s12, [#allocation12], %s1866_s19, %s1866_s19, %s1867_s20  }
  0x76   :  { %s1874_s27 = smov [#allocation14]   ;;  %s1809_s13 = scalar_lea.hbm %s2255_s7, 1024 }
  0x77   :  { %s107_s28 = sshll.u32 %s1874_s27, 4  ;;  %p1810_p0 = scmp.ne.s32.totalorder %s2255_s7, %s1809_s13  ;;  %s108_s28 = int_to_ptr.vmem [resolvable:$true] %s107_s28 }
  0x78   :  { %p1813_p1 = scmp.lt.u32.totalorder %s1809_s13, %s2255_s7 }
  0x7a   :  { %p1815_p2 = pnand %p1813_p1, %p1810_p0 }
  0x7c   :  { %1818 = shalt.err (!%p1815_p2)
}
  0x7d   :  { %s1819_s5 = scalar_lea.vmem %s108_s28, 1024  ;;  %p1824_p4 = scmp.lt.s32.totalorder %s108_s28, %s108_s28 }
  0x7e   :  { %p1820_p3 = scmp.ne.s32.totalorder %s108_s28, %s1819_s5  ;;  %p1825_p5 = scmp.lt.s32.totalorder %s1819_s5, %s1819_s5 }
  0x80   :  { %p1826_p6 = por %p1825_p5, %p1824_p4 }
  0x82   :  { %p1827_p7 = pnand %p1826_p6, %p1820_p3 }
  0x84   :  { %1830 = shalt.err (!%p1827_p7)
}
  0x85   :  { %113 = dma.hbm_to_vmem [thread:$0]  %s2255_s7, 1024, %s108_s28, [#allocation15], %s1866_s19, %s1866_s19, %s1867_s20  }
  0x86   :  { %1853 = dma.done.wait [#allocation3], 64  }
  0x87   :  { %1854 = vsyncadd [#allocation3], 4294967232 }
  0x88   :  { %1855 = dma.done.wait [#allocation6], 1024  }
  0x89   :  { %1856 = vsyncadd [#allocation6], 4294966272 }
  0x8a   :  { %1857 = dma.done.wait [#allocation9], 640  }
  0x8b   :  { %1858 = vsyncadd [#allocation9], 4294966656 }
  0x8c   :  { %1859 = dma.done.wait [#allocation12], 1408  }
  0x8d   :  { %1860 = vsyncadd [#allocation12], 4294965888 }
  0x8e   :  { %1861 = dma.done.wait [#allocation15], 1024  }
  0x8f   :  { %1862 = vsyncadd [#allocation15], 4294966272  ;;  %v1875_v0 = vmov 0.0   ;;  %vm1876_vm0 = vmmov 0   ;;  %v1626_v1 = vld [vmem:[#allocation8] sm:$0xff]   ;;  %v1627_v2 = vld [vmem:[#allocation10] sm:$0xff]  }
  0x90   :  { %1403 = vmatprep.subr.bf16.mxu0 %v1875_v0  ;;  %1413 = vmatprep.subr.bf16.mxu1 %v1875_v0  ;;  %v1628_v3 = vld [vmem:[#allocation8 + $0x8] sm:$0xff]   ;;  %v2052_v4 = vld [vmem:[#allocation10 + $0x8] sm:$0xff]   ;;  %vm171_vm1 = vcmask 1043456   ;;  %v1630_v5 = vld [vmem:[#allocation8 + $0x10] ss:$0 sps:$4 sm:$0xff]   ;;  %vm167_vm2 = vcmask 326656  }
  0x91   :  { %1409 = vmatprep.mubr.msk.bf16.mxu0 %vm1876_vm0, %v1875_v0  ;;  %1419 = vmatprep.mubr.msk.bf16.mxu1 %vm1876_vm0, %v1875_v0  ;;  %v1631_v6 = vld [vmem:[#allocation10 + $0x10] ss:$0 sps:$4 sm:$0xff]   ;;  %v173_v7 = vsel %vm171_vm1, %v1630_v5, 0  ;;  %v141_v9 = vld [vmem:[#allocation2] sm:$0xf]  ;;  %v2087_v15 = vld [vmem:[#allocation11] sm:$0xff]  }
  0x92   :  { %1404 = vmatpush3.bf16.msra.mxu0 %v1626_v1  ;;  %1414 = vmatpush3.bf16.msra.mxu1 %v1627_v2  ;;  %v241_v8 = vsel %vm171_vm1, %v1631_v6, 0  ;;  %v221_v10 = vld [vmem:[#allocation5] sm:$0xf]  ;;  %v284_v11 = vld [vmem:[#allocation5 + $0x4] sm:$0xf]  ;;  %v2094_v16 = vld [vmem:[#allocation11 + $0x8] sm:$0xff]  }
  0x93   :  { %1405 = vmatprep.subr.bf16.mxu0 %v1875_v0  ;;  %1415 = vmatprep.subr.bf16.mxu1 %v1875_v0  ;;  %v330_v12 = vld [vmem:[#allocation5 + $0x8] sm:$0xf]  ;;  %v376_v13 = vld [vmem:[#allocation5 + $0xc] sm:$0xf]  ;;  %v422_v14 = vld [vmem:[#allocation5 + $0x10] sm:$0xf] }
  0x94   :  { %v2104_v17 = vld [vmem:[#allocation11 + $0x10] sm:$0xff]   ;;  %v468_v18 = vld [vmem:[#allocation5 + $0x14] sm:$0xf]  ;;  %vm545_vm3 = vcmask 392192   ;;  %v636_v21 = vld [vmem:[#allocation7 + $0x8] sm:$0xf] }
  0x95   :  { %v526_v19 = vld [vmem:[#allocation7] sm:$0xf]  ;;  %v590_v20 = vld [vmem:[#allocation7 + $0x4] sm:$0xf]  ;;  %v682_v22 = vld [vmem:[#allocation7 + $0xc] sm:$0xf] }
  0x96   :  { %1406 = vmatpush3.bf16.msra.mxu0 %v1628_v3  ;;  %1416 = vmatpush3.bf16.msra.mxu1 %v2052_v4  ;;  %v728_v23 = vld [vmem:[#allocation7 + $0x10] sm:$0xf]  ;;  %v774_v24 = vld [vmem:[#allocation7 + $0x14] sm:$0xf]  ;;  %v820_v25 = vld [vmem:[#allocation7 + $0x18] sm:$0xf] }
  0x97   :  { %1407 = vmatprep.subr.bf16.mxu0 %v1875_v0  ;;  %1417 = vmatprep.subr.bf16.mxu1 %v1875_v0  ;;  %v866_v26 = vld [vmem:[#allocation7 + $0x1c] sm:$0xf]  ;;  %v912_v27 = vld [vmem:[#allocation7 + $0x20] sm:$0xf]  ;;  %v958_v28 = vld [vmem:[#allocation7 + $0x24] sm:$0xf] }
  0x98   :  { %v1635_v29 = vld [vmem:[#allocation13] sm:$0xff]   ;;  %v1636_v30 = vld [vmem:[#allocation13 + $0x8] sm:$0xff]   ;;  %v1637_v31 = vld [vmem:[#allocation13 + $0x10] sm:$0xff]  }
  0x99   :  { %v1638_v32 = vld [vmem:[#allocation13 + $0x18] sm:$0xff]   ;;  %v1639_v33 = vld [vmem:[#allocation13 + $0x20] sm:$0xff]   ;;  %v1640_v34 = vld [vmem:[#allocation13 + $0x28] sm:$0xff]  }
  0x9a   :  { %1408 = vmatpush3.bf16.msra.mxu0 %v173_v7  ;;  %1418 = vmatpush3.bf16.msra.mxu1 %v241_v8  ;;  %v1641_v35 = vld [vmem:[#allocation13 + $0x30] sm:$0xff]   ;;  %v1642_v36 = vld [vmem:[#allocation13 + $0x38] sm:$0xff]   ;;  %v1643_v37 = vld [vmem:[#allocation14] sm:$0xff]  }
  0x9b   :  { %1423 = vmatprep.subr.bf16.mxu0 %v1875_v0  ;;  %1433 = vmatprep.subr.bf16.mxu1 %v1875_v0  ;;  %v1644_v38 = vld [vmem:[#allocation14 + $0x8] sm:$0xff]   ;;  %v1645_v39 = vld [vmem:[#allocation14 + $0x10] sm:$0xff]   ;;  %v1646_v40 = vld [vmem:[#allocation14 + $0x18] sm:$0xff]  }
  0x9c   :  { %v1647_v41 = vld [vmem:[#allocation14 + $0x20] sm:$0xff]   ;;  %v1648_v42 = vld [vmem:[#allocation14 + $0x28] sm:$0xff]  }
  0x9d   :  { %1410 = vmatmul.mubr.msk.bf16.vlgmr.msra.gmra.mrb[0].mxu0 %vm167_vm2, %v141_v9  ;;  %1420 = vmatmul.mubr.msk.bf16.vlgmr.msra.gmra.mrb[0].mxu1 %vm167_vm2, %v221_v10  ;;  %v1284_v10 = vld [vmem:[%s2256_s8 + $0x1] ss:$0 sm:$0xff] }
  0x9e   :  { %1424 = vmatpush3.bf16.msra.mxu0 %v1627_v2  ;;  %1434 = vmatpush3.bf16.msra.mxu1 %v1627_v2 }
  0x9f   :  { %1425 = vmatprep.subr.bf16.mxu0 %v1875_v0  ;;  %1435 = vmatprep.subr.bf16.mxu1 %v1875_v0 }
  0xa0   :  { %1429 = vmatprep.mubr.msk.bf16.mxu0 %vm1876_vm0, %v1875_v0  ;;  %1439 = vmatprep.mubr.msk.bf16.mxu1 %vm1876_vm0, %v1875_v0 }
  0xa2   :  { %1426 = vmatpush3.bf16.msra.mxu0 %v2052_v4  ;;  %1436 = vmatpush3.bf16.msra.mxu1 %v2052_v4 }
  0xa3   :  { %1427 = vmatprep.subr.bf16.mxu0 %v1875_v0  ;;  %1437 = vmatprep.subr.bf16.mxu1 %v1875_v0 }
  0xa6   :  { %1428 = vmatpush3.bf16.msra.mxu0 %v241_v8  ;;  %1438 = vmatpush3.bf16.msra.mxu1 %v241_v8 }
  0xa7   :  { %1443 = vmatprep.subr.bf16.mxu0 %v1875_v0  ;;  %1453 = vmatprep.subr.bf16.mxu1 %v1875_v0 }
  0xa9   :  { %1430 = vmatmul.mubr.msk.bf16.vlgmr.msra.gmra.mrb[4].mxu0 %vm167_vm2, %v284_v11  ;;  %1440 = vmatmul.mubr.msk.bf16.vlgmr.msra.gmra.mrb[4].mxu1 %vm167_vm2, %v330_v12 }
  0xaa   :  { %1444 = vmatpush3.bf16.msra.mxu0 %v1627_v2  ;;  %1454 = vmatpush3.bf16.msra.mxu1 %v1627_v2 }
  0xab   :  { %1445 = vmatprep.subr.bf16.mxu0 %v1875_v0  ;;  %1455 = vmatprep.subr.bf16.mxu1 %v1875_v0 }
  0xac   :  { %1449 = vmatprep.mubr.msk.bf16.mxu0 %vm1876_vm0, %v1875_v0  ;;  %1459 = vmatprep.mubr.msk.bf16.mxu1 %vm1876_vm0, %v1875_v0 }
  0xae   :  { %1446 = vmatpush3.bf16.msra.mxu0 %v2052_v4  ;;  %1456 = vmatpush3.bf16.msra.mxu1 %v2052_v4 }
  0xaf   :  { %1447 = vmatprep.subr.bf16.mxu0 %v1875_v0  ;;  %1457 = vmatprep.subr.bf16.mxu1 %v1875_v0 }
  0xb2   :  { %1448 = vmatpush3.bf16.msra.mxu0 %v241_v8  ;;  %1458 = vmatpush3.bf16.msra.mxu1 %v241_v8 }
  0xb3   :  { %1463 = vmatprep.subr.bf16.mxu0 %v1875_v0  ;;  %1473 = vmatprep.subr.bf16.mxu1 %v1875_v0 }
  0xb5   :  { %1450 = vmatmul.mubr.msk.bf16.vlgmr.msra.gmra.mrb[8].mxu0 %vm167_vm2, %v376_v13  ;;  %1460 = vmatmul.mubr.msk.bf16.vlgmr.msra.gmra.mrb[8].mxu1 %vm167_vm2, %v422_v14 }
  0xb6   :  { %1464 = vmatpush3.bf16.msra.mxu0 %v1627_v2  ;;  %1474 = vmatpush3.bf16.msra.mxu1 %v2087_v15 }
  0xb7   :  { %1465 = vmatprep.subr.bf16.mxu0 %v1875_v0  ;;  %1475 = vmatprep.subr.bf16.mxu1 %v1875_v0 }
  0xb8   :  { %1469 = vmatprep.mubr.msk.bf16.mxu0 %vm1876_vm0, %v1875_v0  ;;  %1479 = vmatprep.mubr.msk.bf16.mxu1 %vm1876_vm0, %v1875_v0 }
  0xba   :  { %1466 = vmatpush3.bf16.msra.mxu0 %v2052_v4  ;;  %1476 = vmatpush3.bf16.msra.mxu1 %v2094_v16 }
  0xbb   :  { %1467 = vmatprep.subr.bf16.mxu0 %v1875_v0  ;;  %1477 = vmatprep.subr.bf16.mxu1 %v1875_v0 }
  0xbe   :  { %1468 = vmatpush3.bf16.msra.mxu0 %v241_v8  ;;  %1478 = vmatpush3.bf16.msra.mxu1 %v2104_v17  ;;  %v1270_v8 = vld [vmem:[%s2256_s8] ss:$0 sm:$0xff] }
  0xbf   :  { %1483 = vmatprep.subr.bf16.mxu0 %v1875_v0  ;;  %1493 = vmatprep.subr.bf16.mxu1 %v1875_v0 }
  0xc1   :  { %1470 = vmatmul.mubr.msk.bf16.vlgmr.msra.gmra.mrb[12].mxu0 %vm167_vm2, %v468_v18  ;;  %1480 = vmatmul.mubr.msk.bf16.vlgmr.msra.gmra.mrb[12].mxu1 %vm545_vm3, %v526_v19 }
  0xc2   :  { %1484 = vmatpush3.bf16.msra.mxu0 %v2087_v15  ;;  %1494 = vmatpush3.bf16.msra.mxu1 %v2087_v15 }
  0xc3   :  { %1485 = vmatprep.subr.bf16.mxu0 %v1875_v0  ;;  %1495 = vmatprep.subr.bf16.mxu1 %v1875_v0 }
  0xc4   :  { %1489 = vmatprep.mubr.msk.bf16.mxu0 %vm1876_vm0, %v1875_v0  ;;  %1499 = vmatprep.mubr.msk.bf16.mxu1 %vm1876_vm0, %v1875_v0 }
  0xc6   :  { %1486 = vmatpush3.bf16.msra.mxu0 %v2094_v16  ;;  %1496 = vmatpush3.bf16.msra.mxu1 %v2094_v16 }
  0xc7   :  { %1487 = vmatprep.subr.bf16.mxu0 %v1875_v0  ;;  %1497 = vmatprep.subr.bf16.mxu1 %v1875_v0 }
  0xca   :  { %1488 = vmatpush3.bf16.msra.mxu0 %v2104_v17  ;;  %1498 = vmatpush3.bf16.msra.mxu1 %v2104_v17 }
  0xcb   :  { %1503 = vmatprep.subr.bf16.mxu0 %v1875_v0  ;;  %1513 = vmatprep.subr.bf16.mxu1 %v1875_v0 }
  0xcd   :  { %1490 = vmatmul.mubr.msk.bf16.vlgmr.msra.gmra.mrb[16].mxu0 %vm545_vm3, %v590_v20  ;;  %1500 = vmatmul.mubr.msk.bf16.vlgmr.msra.gmra.mrb[16].mxu1 %vm545_vm3, %v636_v21 }
  0xce   :  { %1504 = vmatpush3.bf16.msra.mxu0 %v2087_v15  ;;  %1514 = vmatpush3.bf16.msra.mxu1 %v2087_v15 }
  0xcf   :  { %1505 = vmatprep.subr.bf16.mxu0 %v1875_v0  ;;  %1515 = vmatprep.subr.bf16.mxu1 %v1875_v0 }
  0xd0   :  { %1509 = vmatprep.mubr.msk.bf16.mxu0 %vm1876_vm0, %v1875_v0  ;;  %1519 = vmatprep.mubr.msk.bf16.mxu1 %vm1876_vm0, %v1875_v0 }
  0xd2   :  { %1506 = vmatpush3.bf16.msra.mxu0 %v2094_v16  ;;  %1516 = vmatpush3.bf16.msra.mxu1 %v2094_v16 }
  0xd3   :  { %1507 = vmatprep.subr.bf16.mxu0 %v1875_v0  ;;  %1517 = vmatprep.subr.bf16.mxu1 %v1875_v0 }
  0xd6   :  { %1508 = vmatpush3.bf16.msra.mxu0 %v2104_v17  ;;  %1518 = vmatpush3.bf16.msra.mxu1 %v2104_v17 }
  0xd7   :  { %1523 = vmatprep.subr.bf16.mxu0 %v1875_v0  ;;  %1533 = vmatprep.subr.bf16.mxu1 %v1875_v0 }
  0xd9   :  { %1510 = vmatmul.mubr.msk.bf16.vlgmr.msra.gmra.mrb[20].mxu0 %vm545_vm3, %v682_v22  ;;  %1520 = vmatmul.mubr.msk.bf16.vlgmr.msra.gmra.mrb[20].mxu1 %vm545_vm3, %v728_v23 }
  0xda   :  { %1524 = vmatpush3.bf16.msra.mxu0 %v2087_v15  ;;  %1534 = vmatpush3.bf16.msra.mxu1 %v2087_v15 }
  0xdb   :  { %1525 = vmatprep.subr.bf16.mxu0 %v1875_v0  ;;  %1535 = vmatprep.subr.bf16.mxu1 %v1875_v0 }
  0xdc   :  { %1529 = vmatprep.mubr.msk.bf16.mxu0 %vm1876_vm0, %v1875_v0  ;;  %1539 = vmatprep.mubr.msk.bf16.mxu1 %vm1876_vm0, %v1875_v0 }
  0xde   :  { %1526 = vmatpush3.bf16.msra.mxu0 %v2094_v16  ;;  %1536 = vmatpush3.bf16.msra.mxu1 %v2094_v16 }
  0xdf   :  { %1527 = vmatprep.subr.bf16.mxu0 %v1875_v0  ;;  %1537 = vmatprep.subr.bf16.mxu1 %v1875_v0 }
  0xe2   :  { %1528 = vmatpush3.bf16.msra.mxu0 %v2104_v17  ;;  %1538 = vmatpush3.bf16.msra.mxu1 %v2104_v17 }
  0xe3   :  { %1543 = vmatprep.subr.bf16.mxu0 %v1875_v0  ;;  %1553 = vmatprep.subr.bf16.mxu1 %v1875_v0 }
  0xe5   :  { %1530 = vmatmul.mubr.msk.bf16.vlgmr.msra.gmra.mrb[24].mxu0 %vm545_vm3, %v774_v24  ;;  %1540 = vmatmul.mubr.msk.bf16.vlgmr.msra.gmra.mrb[24].mxu1 %vm545_vm3, %v820_v25 }
  0xe6   :  { %1544 = vmatpush3.bf16.msra.mxu0 %v2087_v15  ;;  %1554 = vmatpush3.bf16.msra.mxu1 %v2087_v15 }
  0xe7   :  { %1545 = vmatprep.subr.bf16.mxu0 %v1875_v0  ;;  %1555 = vmatprep.subr.bf16.mxu1 %v1875_v0 }
  0xe8   :  { %1549 = vmatprep.mubr.msk.bf16.mxu0 %vm1876_vm0, %v1875_v0  ;;  %1559 = vmatprep.mubr.msk.bf16.mxu1 %vm1876_vm0, %v1875_v0 }
  0xea   :  { %1546 = vmatpush3.bf16.msra.mxu0 %v2094_v16  ;;  %1556 = vmatpush3.bf16.msra.mxu1 %v2094_v16 }
  0xeb   :  { %1547 = vmatprep.subr.bf16.mxu0 %v1875_v0  ;;  %1557 = vmatprep.subr.bf16.mxu1 %v1875_v0 }
  0xee   :  { %1548 = vmatpush3.bf16.msra.mxu0 %v2104_v17  ;;  %1558 = vmatpush3.bf16.msra.mxu1 %v2104_v17 }
  0xef   :  { %1563 = vmatprep.subr.bf16.mxu0 %v1875_v0  ;;  %1573 = vmatprep.subr.bf16.mxu1 %v1875_v0 }
  0xf1   :  { %1550 = vmatmul.mubr.msk.bf16.vlgmr.msra.gmra.mrb[28].mxu0 %vm545_vm3, %v866_v26  ;;  %1560 = vmatmul.mubr.msk.bf16.vlgmr.msra.gmra.mrb[28].mxu1 %vm545_vm3, %v912_v27 }
  0xf2   :  { %1564 = vmatpush3.bf16.msra.mxu0 %v2087_v15  ;;  %1569 = vmatprep.mubr.msk.bf16.mxu0 %vm1876_vm0, %v1875_v0 }
  0xf3   :  { %1565 = vmatprep.subr.bf16.mxu0 %v1875_v0  ;;  %1589 = vmatprep.mubr.msk.bf16.mxu1 %vm1876_vm0, %v1875_v0 }
  0xf4   :  { %1574 = vmatpush3.bf16.msra.mxu1 %v1635_v29 }
  0xf5   :  { %1575 = vmatprep.subr.bf16.mxu1 %v1875_v0 }
  0xf6   :  { %1566 = vmatpush3.bf16.msra.mxu0 %v2094_v16 }
  0xf7   :  { %1567 = vmatprep.subr.bf16.mxu0 %v1875_v0 }
  0xf8   :  { %1576 = vmatpush3.bf16.msra.mxu1 %v1636_v30 }
  0xf9   :  { %1577 = vmatprep.subr.bf16.mxu1 %v1875_v0 }
  0xfa   :  { %1568 = vmatpush3.bf16.msra.mxu0 %v2104_v17 }
  0xfb   :  { %1593 = vmatprep.subr.bf16.mxu0 %v1875_v0 }
  0xfc   :  { %1578 = vmatpush3.bf16.msra.mxu1 %v1637_v31 }
  0xfd   :  { %1570 = vmatmul.mubr.msk.bf16.vlgmr.msra.gmra.mrb[32].mxu0 %vm545_vm3, %v958_v28  ;;  %1579 = vmatprep.subr.bf16.mxu1 %v1875_v0 }
  0xfe   :  { %1609 = vmatprep.mubr.msk.bf16.mxu0 %vm1876_vm0, %v1875_v0  ;;  %1594 = vmatpush3.bf16.msra.mxu0 %v1643_v37 }
  0xff   :  { %1595 = vmatprep.subr.bf16.mxu0 %v1875_v0 }
 0x100   :  { %1580 = vmatpush3.bf16.msra.mxu1 %v1638_v32 }
 0x101   :  { %1581 = vmatprep.subr.bf16.mxu1 %v1875_v0 }
 0x102   :  { %1596 = vmatpush3.bf16.msra.mxu0 %v1644_v38 }
 0x103   :  { %1597 = vmatprep.subr.bf16.mxu0 %v1875_v0 }
 0x104   :  { %1582 = vmatpush3.bf16.msra.mxu1 %v1639_v33 }
 0x105   :  { %1583 = vmatprep.subr.bf16.mxu1 %v1875_v0 }
 0x106   :  { %1598 = vmatpush3.bf16.msra.mxu0 %v1645_v39 }
 0x107   :  { %1599 = vmatprep.subr.bf16.mxu0 %v1875_v0 }
 0x108   :  { %1584 = vmatpush3.bf16.msra.mxu1 %v1640_v34 }
 0x109   :  { %1585 = vmatprep.subr.bf16.mxu1 %v1875_v0 }
 0x10a   :  { %1600 = vmatpush3.bf16.msra.mxu0 %v1646_v40 }
 0x10b   :  { %1601 = vmatprep.subr.bf16.mxu0 %v1875_v0 }
 0x10c   :  { %1586 = vmatpush3.bf16.msra.mxu1 %v1641_v35 }
 0x10d   :  { %1587 = vmatprep.subr.bf16.mxu1 %v1875_v0 }
 0x10e   :  { %1602 = vmatpush3.bf16.msra.mxu0 %v1647_v41 }
 0x10f   :  { %1603 = vmatprep.subr.bf16.mxu0 %v1875_v0 }
 0x110   :  { %1588 = vmatpush3.bf16.msra.mxu1 %v1642_v36 }
 0x112   :  { %1604 = vmatpush3.bf16.msra.mxu0 %v1648_v42 }
 0x113   :  { %1605 = vmatprep.subr.bf16.mxu0 %v1875_v0 }
 0x170   :  { %v209_v43 = vpop.f32.mrb[0].mxu0  ;;  %v277_v45 = vpop.f32.mrb[0].mxu1 }
 0x171   :  { %v1411_v44 = vpop.f32.mrb[1].mxu0  ;;  %v1421_v47 = vpop.f32.mrb[1].mxu1  ;;  %v210_v11 = vadd.f32 %v1270_v8, %v209_v43 }
 0x172   :  { %v212_v46 = vpop.f32.mrb[2].mxu0  ;;  %v280_v49 = vpop.f32.mrb[2].mxu1 }
 0x173   :  { %v1412_v48 = vpop.f32.mrb[3].mxu0  ;;  %v1422_v50 = vpop.f32.mrb[3].mxu1  ;;  %v215_v21 = vmax.f32 %v210_v11, 0.0  ;;  %v1649_v11 = vld [vmem:[#allocation14 + $0x30] sm:$0xff]  }
 0x174   :  { %1606 = vmatpush3.bf16.msra.mxu0 %v1649_v11 }
 0x175   :  { %1607 = vmatprep.subr.bf16.mxu0 %v1875_v0  ;;  %v1308_v0 = vld [vmem:[%s2256_s8 + $0x4] ss:$0 sm:$0xff] }
 0x17c   :  { %v322_v51 = vpop.f32.mrb[4].mxu0  ;;  %v368_v54 = vpop.f32.mrb[4].mxu1 }
 0x17d   :  { %v328_v52 = vmax.f32 %v277_v45, %v322_v51  ;;  %v1431_v53 = vpop.f32.mrb[5].mxu0  ;;  %v1441_v56 = vpop.f32.mrb[5].mxu1 }
 0x17e   :  { %v325_v55 = vpop.f32.mrb[6].mxu0  ;;  %v371_v59 = vpop.f32.mrb[6].mxu1 }
 0x17f   :  { %v374_v57 = vmax.f32 %v328_v52, %v368_v54  ;;  %v1432_v58 = vpop.f32.mrb[7].mxu0  ;;  %v1442_v60 = vpop.f32.mrb[7].mxu1 }
 0x188   :  { %v414_v61 = vpop.f32.mrb[8].mxu0  ;;  %v460_v1 = vpop.f32.mrb[8].mxu1 }
 0x189   :  { %v420_v62 = vmax.f32 %v374_v57, %v414_v61  ;;  %v1451_v63 = vpop.f32.mrb[9].mxu0  ;;  %v1461_v3 = vpop.f32.mrb[9].mxu1 }
 0x18a   :  { %v417_v2 = vpop.f32.mrb[10].mxu0  ;;  %v463_v6 = vpop.f32.mrb[10].mxu1 }
 0x18b   :  { %v466_v4 = vmax.f32 %v420_v62, %v460_v1  ;;  %v1452_v5 = vpop.f32.mrb[11].mxu0  ;;  %v1462_v7 = vpop.f32.mrb[11].mxu1  ;;  %v1298_v2 = vld [vmem:[%s2256_s8 + $0x2] ss:$0 sm:$0xff] }
 0x194   :  { %v506_v9 = vpop.f32.mrb[12].mxu0  ;;  %v583_v14 = vpop.f32.mrb[12].mxu1 }
 0x195   :  { %v512_v12 = vmax.f32 %v466_v4, %v506_v9  ;;  %v1471_v13 = vpop.f32.mrb[13].mxu0  ;;  %v1481_v16 = vpop.f32.mrb[13].mxu1 }
 0x196   :  { %v509_v15 = vpop.f32.mrb[14].mxu0  ;;  %v586_v19 = vpop.f32.mrb[14].mxu1  ;;  %v1299_v13 = vld [vmem:[%s2256_s8 + $0x3] ss:$0 sm:$0xff]  ;;  %s1877_s8 = smov [#allocation16]  }
 0x197   :  { %v518_v17 = vadd.f32 %v1284_v10, %v512_v12  ;;  %v1472_v18 = vpop.f32.mrb[15].mxu0  ;;  %v1482_v20 = vpop.f32.mrb[15].mxu1  ;;  %v1650_v12 = vld [vmem:[#allocation14 + $0x38] sm:$0xff]   ;;  %s1257_s22 = sshll.u32 %s1877_s8, 4  ;;  %s1258_s22 = int_to_ptr.vmem [resolvable:$true] %s1257_s22 }
 0x198   :  { %1608 = vmatpush3.bf16.msra.mxu0 %v1650_v12  ;;  %s1831_s23 = scalar_lea.vmem %s1258_s22, 128  ;;  %p1836_p9 = scmp.lt.s32.totalorder %s1258_s22, %s1258_s22 }
 0x199   :  { %v519_v22 = vmax.f32 %v518_v17, 0.0  ;;  %p1832_p8 = scmp.ne.s32.totalorder %s1258_s22, %s1831_s23  ;;  %p1837_p10 = scmp.lt.s32.totalorder %s1831_s23, %s1831_s23 }
 0x19b   :  { %v1010_v23 = vadd.f32 %v519_v22, %v215_v21  ;;  %v1233_v21 = vlaneseq  ;;  %p1838_p11 = por %p1837_p10, %p1836_p9 }
 0x19d   :  { %v1234_v22 = vand.u32 127, %v1233_v21  ;;  %p1839_p12 = pnand %p1838_p11, %p1832_p8 }
 0x19f   :  { %vm1235_vm4 = vcmp.ge.s32.totalorder %v1234_v22, 96  ;;  %vm1236_vm5 = vcmp.lt.s32.totalorder %v1234_v22, 100 }
 0x1a0   :  { %v628_v24 = vpop.f32.mrb[16].mxu0  ;;  %v674_v27 = vpop.f32.mrb[16].mxu1  ;;  %vm2226_vm6 = vmand %vm1235_vm4, %vm1236_vm5 }
 0x1a1   :  { %v634_v25 = vmax.f32 %v583_v14, %v628_v24  ;;  %v1491_v26 = vpop.f32.mrb[17].mxu0  ;;  %v1501_v29 = vpop.f32.mrb[17].mxu1 }
 0x1a2   :  { %v631_v28 = vpop.f32.mrb[18].mxu0  ;;  %v677_v32 = vpop.f32.mrb[18].mxu1 }
 0x1a3   :  { %v680_v30 = vmax.f32 %v634_v25, %v674_v27  ;;  %v1492_v31 = vpop.f32.mrb[19].mxu0  ;;  %v1502_v33 = vpop.f32.mrb[19].mxu1 }
 0x1ac   :  { %v720_v34 = vpop.f32.mrb[20].mxu0  ;;  %v766_v37 = vpop.f32.mrb[20].mxu1 }
 0x1ad   :  { %v726_v35 = vmax.f32 %v680_v30, %v720_v34  ;;  %v1511_v36 = vpop.f32.mrb[21].mxu0  ;;  %v1521_v39 = vpop.f32.mrb[21].mxu1 }
 0x1ae   :  { %v723_v38 = vpop.f32.mrb[22].mxu0  ;;  %v769_v42 = vpop.f32.mrb[22].mxu1 }
 0x1af   :  { %v772_v40 = vmax.f32 %v726_v35, %v766_v37  ;;  %v1512_v41 = vpop.f32.mrb[23].mxu0  ;;  %v1522_v43 = vpop.f32.mrb[23].mxu1 }
 0x1b8   :  { %v812_v44 = vpop.f32.mrb[24].mxu0  ;;  %v858_v47 = vpop.f32.mrb[24].mxu1 }
 0x1b9   :  { %v818_v45 = vmax.f32 %v772_v40, %v812_v44  ;;  %v1531_v46 = vpop.f32.mrb[25].mxu0  ;;  %v1541_v49 = vpop.f32.mrb[25].mxu1 }
 0x1ba   :  { %v815_v48 = vpop.f32.mrb[26].mxu0  ;;  %v861_v52 = vpop.f32.mrb[26].mxu1 }
 0x1bb   :  { %v864_v50 = vmax.f32 %v818_v45, %v858_v47  ;;  %v1532_v51 = vpop.f32.mrb[27].mxu0  ;;  %v1542_v53 = vpop.f32.mrb[27].mxu1 }
 0x1c4   :  { %v904_v54 = vpop.f32.mrb[28].mxu0  ;;  %v950_v57 = vpop.f32.mrb[28].mxu1 }
 0x1c5   :  { %v910_v55 = vmax.f32 %v864_v50, %v904_v54  ;;  %v1551_v56 = vpop.f32.mrb[29].mxu0  ;;  %v1561_v59 = vpop.f32.mrb[29].mxu1 }
 0x1c6   :  { %v907_v58 = vpop.f32.mrb[30].mxu0  ;;  %v953_v62 = vpop.f32.mrb[30].mxu1 }
 0x1c7   :  { %v956_v60 = vmax.f32 %v910_v55, %v950_v57  ;;  %v1552_v61 = vpop.f32.mrb[31].mxu0  ;;  %v1562_v63 = vpop.f32.mrb[31].mxu1 }
 0x1d0   :  { %v996_v1 = vpop.f32.mrb[32].mxu0 }
 0x1d1   :  { %v1002_v3 = vmax.f32 %v956_v60, %v996_v1  ;;  %v1571_v4 = vpop.f32.mrb[33].mxu0 }
 0x1d2   :  { %v999_v5 = vpop.f32.mrb[34].mxu0 }
 0x1d3   :  { %v1008_v6 = vadd.f32 %v1298_v2, %v1002_v3  ;;  %v1572_v7 = vpop.f32.mrb[35].mxu0 }
 0x1d5   :  { %v1009_v8 = vmax.f32 %v1008_v6, 0.0 }
 0x1d7   :  { %v1011_v9 = vadd.f32 %v1010_v23, %v1009_v8 }
 0x1d9   :  { %v1012_v10 = vpack.c.bf16 %v1011_v9, %v1011_v9 }
 0x1db   :  { %1590 = vmatmul.mubr.bf16.vlgmr.msra.gmra.mrb[32].mxu1 %v1012_v10 }
 0x2ae   :  { %v1116_v14 = vpop.f32.mrb[32].mxu1 }
 0x2af   :  { %v1117_v15 = vadd.f32 %v1299_v13, %v1116_v14  ;;  %v1591_v16 = vpop.f32.mrb[33].mxu1 }
 0x2b0   :  { %v1119_v17 = vpop.f32.mrb[34].mxu1 }
 0x2b1   :  { %v1122_v18 = vmax.f32 %v1117_v15, 0.0  ;;  %v1592_v19 = vpop.f32.mrb[35].mxu1 }
 0x2b3   :  { %v1123_v20 = vpack.c.bf16 %v1122_v18, %v1122_v18 }
 0x2b5   :  { %1610 = vmatmul.mubr.bf16.vlgmr.msra.gmra.mrb[36].mxu0 %v1123_v20 }
 0x388   :  { %v1227_v23 = vpop.f32.mrb[36].mxu0 }
 0x389   :  { %v1228_v25 = vadd.f32 %v1308_v0, %v1227_v23  ;;  %v1611_v26 = vpop.f32.mrb[37].mxu0 }
 0x38a   :  { %v1230_v27 = vpop.f32.mrb[38].mxu0 }
 0x38b   :  { %v1612_v28 = vpop.f32.mrb[39].mxu0  ;;  %v1238_v29 = vsel %vm2226_vm6, %v1228_v25, -1e+30 }
 0x38c   :  { %1239 = vmax.xlane.f32.xlu0 %v1238_v29 }
 0x419   :  { %v1240_v30 = vpop.xlane.xlu0 %1239 }
 0x41a   :  { %v1241_v31 = vsub.f32 %v1238_v29, %v1240_v30 }
 0x41c   :  { %v1242_v32 = vmul.f32 1.442695, %v1241_v31 }
 0x41e   :  { %1651 = vpow2.f32 %v1242_v32 }
 0x428   :  { %v1652_v33 = vpop.eup %1651 }
 0x429   :  { %v1244_v34 = vsel %vm2226_vm6, %v1652_v33, 0.0 }
 0x42a   :  { %1245 = vadd.xlane.f32.xlu0 %v1244_v34 }
 0x4b7   :  { %v1246_v35 = vpop.xlane.xlu0 %1245 }
 0x4b8   :  { %1653 = vrcp.f32 %v1246_v35 }
 0x4c2   :  { %v1654_v36 = vpop.eup %1653 }
 0x4c3   :  { %v1248_v37 = vmul.f32 %v1654_v36, %v1244_v34 }
 0x4c5   :  { %v1249_v38 = vsel %vm2226_vm6, %v1248_v37, %v1228_v25 }
 0x4c6   :  { %1250 = vst [vmem:[#allocation16] sm:$0xff] %v1249_v38 }
 0x4c7   :  { %1842 = shalt.err (!%p1839_p12)
}
 0x4c8   :  { %s1843_s24 = scalar_lea.hbm %s2257_s9, 128 }
 0x4c9   :  { %p1844_p13 = scmp.ne.s32.totalorder %s2257_s9, %s1843_s24  ;;  %p1847_p0 = scmp.lt.u32.totalorder %s1843_s24, %s2257_s9 }
 0x4cb   :  { %p1849_p1 = pnand %p1847_p0, %p1844_p13 }
 0x4cd   :  { %1852 = shalt.err (!%p1849_p1)
}
 0x4ce   :  { %1260 = dma.vmem_to_hbm [thread:$0]  %s1258_s22, 128, %s2257_s9, [#allocation4]  }
 0x4cf   :  { %1863 = dma.done.wait [#allocation4], 128  }
 0x4d0   :  { %1864 = vsyncadd [#allocation4], 4294967168 }
 0x4d1   :  { %1264 = vsyncpa [#allocation3], 1 }
 0x4d2   :  { %1265 = vsyncpa [#allocation6], 1 }
 0x4d3   :  { %1266 = vsyncpa [#allocation9], 1 }
 0x4d4   :  { %1267 = vsyncpa [#allocation12], 1 }
 0x4d5   :  { %1268 = vsyncpa [#allocation15], 1 }
 0x4d6   :  { %1269 = vsyncpa [#allocation4], 1 }

</bundles_post_ra>
